<compile_context>
chip_gen: v7x
topology: tpu7x:2x2x1
jax: 0.10.0
libtpu: 0.0.40
codegen_flags: <defaults>
</compile_context>

<pallas_src>
import functools

import jax
import jax.numpy as jnp
from jax.experimental import pallas as pl
from jax.experimental.pallas import tpu as pltpu


def _round_up(x, m):
    return ((x + m - 1) // m) * m


def _cdiv(a, b):
    return (a + b - 1) // b


_VMEM_LIMIT = 32 * 1024 * 1024


# ----------------------------------------------------------------------------
# Kernel 1: fused 4x4 valid conv (+bias, optional LeakyReLU) as a tap-GEMM
# ----------------------------------------------------------------------------

def _conv4x4_kernel(xm_ref, xh_ref, w_ref, b_ref, o_ref, acc_ref, *,
                    tr, wp, ho, wo, apply_act, neg_slope):
    """One (image, row-tile) step of the 4x4 valid conv.

    xm_ref: (1, tr*wp, 4*Cin) bf16  -- main block (tr image rows, width-im2col)
    xh_ref: (1, 8*wp, 4*Cin)  bf16  -- halo block (next 8 image rows)
    w_ref : (4, 4*Cin, Cout)  bf16  -- per-dy tap weights
    b_ref : (1, Cout)          f32
    o_ref : (1, tr*wp, Cout)        -- out rows/cols beyond (ho, wo) are zeroed
    acc_ref: (tr*wp, Cout)     f32  VMEM scratch
    """
    t = pl.program_id(1)

    # dy = 0 tap initialises the accumulator (also acts as the zero-init).
    acc_ref[...] = jnp.dot(xm_ref[0], w_ref[0],
                           preferred_element_type=jnp.float32)
    for dy in (1, 2, 3):
        w_dy = w_ref[dy]                                  # (4*Cin, Cout)
        rows_a = (tr - dy) * wp                           # sublane-aligned split
        acc_ref[pl.ds(0, rows_a), :] += jnp.dot(
            xm_ref[0, pl.ds(dy * wp, rows_a), :], w_dy,
            preferred_element_type=jnp.float32)
        acc_ref[pl.ds(rows_a, dy * wp), :] += jnp.dot(
            xh_ref[0, pl.ds(0, dy * wp), :], w_dy,
            preferred_element_type=jnp.float32)

    y = acc_ref[...] + b_ref[...]
    if apply_act:
        y = jnp.where(y >= 0.0, y, neg_slope * y)

    # Zero rows outside the true (ho, wo) output extent so that the downstream
    # instance-norm statistics (sum / sum-of-squares) can ignore padding.
    flat = t * (tr * wp) + jax.lax.broadcasted_iota(jnp.int32, (tr * wp, 1), 0)
    row = flat // wp
    col = flat - row * wp
    valid = (row < ho) & (col < wo)
    o_ref[0] = jnp.where(valid, y, 0.0).astype(o_ref.dtype)


def conv4x4_bias_act(x_nhwc, w_taps, bias, *, apply_act, neg_slope=0.2,
                     out_dtype=jnp.bfloat16, rows_target=8192):
    """4x4 valid conv (stride 1) + bias (+LeakyReLU) via a Pallas tap-GEMM.

    x_nhwc : (N, H, W, Cin) float
    w_taps : (4, 4*Cin, Cout) with index [dy, dx*Cin + cin, cout]
    bias   : (Cout,)
    Returns (y_flat, geom): y_flat is (N, R*Wp, Cout) with R = T*tr padded rows
    and width padded to Wp; entries outside the true (Ho, Wo) extent are zero.
    """
    N, H, W, Cin = x_nhwc.shape
    Ho, Wo = H - 3, W - 3
    C4 = 4 * Cin
    Cout = w_taps.shape[-1]
    Wp = _round_up(Wo, 8)
    tr = max(8, min(_round_up(Ho, 8), (rows_target // Wp) // 8 * 8))
    T = _cdiv(Ho, tr)
    Hp = (T + 1) * tr            # both tr*Wp and 8*Wp blockings divide Hp*Wp

    # Width-only im2col (4x, bf16); the 4 dy (row) taps are applied in-kernel.
    xb = x_nhwc.astype(jnp.bfloat16)
    cols = jnp.concatenate([xb[:, :, dx:dx + Wo, :] for dx in range(4)], axis=-1)
    cols = jnp.pad(cols, ((0, 0), (0, Hp - H), (0, Wp - Wo), (0, 0)))
    cols = cols.reshape(N, Hp * Wp, C4)

    w_taps = w_taps.astype(jnp.bfloat16)
    bias2 = bias.astype(jnp.float32).reshape(1, Cout)

    kernel = functools.partial(_conv4x4_kernel, tr=tr, wp=Wp, ho=Ho, wo=Wo,
                               apply_act=apply_act, neg_slope=neg_slope)
    y = pl.pallas_call(
        kernel,
        out_shape=jax.ShapeDtypeStruct((N, T * tr * Wp, Cout), out_dtype),
        grid_spec=pltpu.PrefetchScalarGridSpec(
            num_scalar_prefetch=0,
            grid=(N, T),
            in_specs=[
                pl.BlockSpec((1, tr * Wp, C4), lambda n, t: (n, t, 0)),
                pl.BlockSpec((1, 8 * Wp, C4),
                             lambda n, t: (n, (t + 1) * (tr // 8), 0)),
                pl.BlockSpec((4, C4, Cout), lambda n, t: (0, 0, 0)),
                pl.BlockSpec((1, Cout), lambda n, t: (0, 0)),
            ],
            out_specs=pl.BlockSpec((1, tr * Wp, Cout), lambda n, t: (n, t, 0)),
            scratch_shapes=[pltpu.VMEM((tr * Wp, Cout), jnp.float32)],
        ),
        compiler_params=pltpu.CompilerParams(
            dimension_semantics=("parallel", "parallel"),
            vmem_limit_bytes=_VMEM_LIMIT),
    )(cols, cols, w_taps, bias2)
    geom = dict(Ho=Ho, Wo=Wo, Wp=Wp, R=T * tr, Cout=Cout)
    return y, geom


# ----------------------------------------------------------------------------
# Kernel 2: InstanceNorm2d(affine=True) + LeakyReLU(0.2)
# ----------------------------------------------------------------------------

def _instnorm_lrelu_kernel(x_ref, g_ref, b_ref, o_ref, *, inv_count, eps,
                           neg_slope):
    x = x_ref[0].astype(jnp.float32)                      # (S, C); pad rows = 0
    mean = jnp.sum(x, axis=0, keepdims=True) * inv_count  # true-count division
    sq = jnp.sum(x * x, axis=0, keepdims=True) * inv_count
    var = jnp.maximum(sq - mean * mean, 0.0)              # biased var (PyTorch)
    y = (x - mean) * jax.lax.rsqrt(var + eps)
    y = y * g_ref[...] + b_ref[...]
    o_ref[0] = jnp.where(y >= 0.0, y, neg_slope * y).astype(o_ref.dtype)


def instance_norm_lrelu(y_flat, gamma, beta, *, count, eps=1e-5, neg_slope=0.2,
                        out_dtype=jnp.float32):
    """y_flat: (N, S, C) with zero rows beyond the true spatial count."""
    # TODO(synk): at production channel counts tile S as an 'arbitrary' grid
    # axis with two-pass (sum/sumsq) statistics instead of one whole-image block.
    N, S, C = y_flat.shape
    kernel = functools.partial(_instnorm_lrelu_kernel, inv_count=1.0 / count,
                               eps=eps, neg_slope=neg_slope)
    return pl.pallas_call(
        kernel,
        out_shape=jax.ShapeDtypeStruct((N, S, C), out_dtype),
        grid_spec=pltpu.PrefetchScalarGridSpec(
            num_scalar_prefetch=0,
            grid=(N,),
            in_specs=[
                pl.BlockSpec((1, S, C), lambda n: (n, 0, 0)),
                pl.BlockSpec((1, C), lambda n: (0, 0)),
                pl.BlockSpec((1, C), lambda n: (0, 0)),
            ],
            out_specs=pl.BlockSpec((1, S, C), lambda n: (n, 0, 0)),
        ),
        compiler_params=pltpu.CompilerParams(
            dimension_semantics=("parallel",),
            vmem_limit_bytes=_VMEM_LIMIT),
    )(y_flat, gamma.reshape(1, C).astype(jnp.float32),
      beta.reshape(1, C).astype(jnp.float32))


# ----------------------------------------------------------------------------
# Kernel 3: final 1x1 conv as a plain bf16 GEMM (+bias)
# ----------------------------------------------------------------------------

def _pointwise_kernel(a_ref, w_ref, b_ref, o_ref):
    acc = jnp.dot(a_ref[...], w_ref[...], preferred_element_type=jnp.float32)
    o_ref[...] = (acc + b_ref[...]).astype(o_ref.dtype)


def pointwise_conv(a, w, b, *, tm=512):
    """a: (M, K), w: (K, Cout), b: (Cout,) -> (M, Cout) f32."""
    M, K = a.shape
    Cout = w.shape[1]
    Mp = _round_up(M, tm)
    a_p = jnp.pad(a.astype(jnp.bfloat16), ((0, Mp - M), (0, 0)))
    out = pl.pallas_call(
        _pointwise_kernel,
        out_shape=jax.ShapeDtypeStruct((Mp, Cout), jnp.float32),
        grid_spec=pltpu.PrefetchScalarGridSpec(
            num_scalar_prefetch=0,
            grid=(Mp // tm,),
            in_specs=[
                pl.BlockSpec((tm, K), lambda i: (i, 0)),
                pl.BlockSpec((K, Cout), lambda i: (0, 0)),
                pl.BlockSpec((1, Cout), lambda i: (0, 0)),
            ],
            out_specs=pl.BlockSpec((tm, Cout), lambda i: (i, 0)),
        ),
        compiler_params=pltpu.CompilerParams(dimension_semantics=("parallel",)),
    )(a_p, w.astype(jnp.bfloat16), b.astype(jnp.float32).reshape(1, Cout))
    return out[:M]


# ----------------------------------------------------------------------------
# Kernel 4: keypoint gaussian heatmaps
# ----------------------------------------------------------------------------

def _heatmap_kernel(dx2_ref, dy2_ref, o_ref, *, kp_variance):
    dx2 = dx2_ref[0, 0]                                    # (1, W)
    dy2 = dy2_ref[0, 0]                                    # (H, 1)
    o_ref[0, 0, :, :] = jnp.exp(-0.5 * (dx2 + dy2) / kp_variance)


def kp2gaussian_pallas(kp, spatial_size, kp_variance):
    """kp: (N, K, 2) with (x, y) in [-1, 1]; returns (N, K, H, W)."""
    Nb, K, _ = kp.shape
    H, W = spatial_size
    xs = 2.0 * (jnp.arange(W, dtype=jnp.float32) / (W - 1)) - 1.0
    ys = 2.0 * (jnp.arange(H, dtype=jnp.float32) / (H - 1)) - 1.0
    dx2 = jnp.square(xs[None, None, :] - kp[:, :, 0:1])[:, :, None, :]  # (N,K,1,W)
    dy2 = jnp.square(ys[None, None, :] - kp[:, :, 1:2])[:, :, :, None]  # (N,K,H,1)

    kernel = functools.partial(_heatmap_kernel, kp_variance=kp_variance)
    return pl.pallas_call(
        kernel,
        out_shape=jax.ShapeDtypeStruct((Nb, K, H, W), jnp.float32),
        grid_spec=pltpu.PrefetchScalarGridSpec(
            num_scalar_prefetch=0,
            grid=(Nb, K),
            in_specs=[
                pl.BlockSpec((1, 1, 1, W), lambda n, k: (n, k, 0, 0)),
                pl.BlockSpec((1, 1, H, 1), lambda n, k: (n, k, 0, 0)),
            ],
            out_specs=pl.BlockSpec((1, 1, H, W), lambda n, k: (n, k, 0, 0)),
        ),
        compiler_params=pltpu.CompilerParams(
            dimension_semantics=("parallel", "parallel")),
    )(dx2, dy2)


# ----------------------------------------------------------------------------
# JAX glue (layout plumbing; thin compute)
# ----------------------------------------------------------------------------

def _bilinear_matrix(n_out, n_in):
    # align_corners=True interpolation weight matrix (n_out, n_in)
    assert n_out >= 2 and n_in >= 2, "bilinear align_corners=True needs size >= 2"
    pos = jnp.arange(n_out, dtype=jnp.float32) * (n_in - 1) / (n_out - 1)
    lo = jnp.clip(jnp.floor(pos).astype(jnp.int32), 0, n_in - 2)
    frac = pos - lo.astype(jnp.float32)
    A = jnp.zeros((n_out, n_in), jnp.float32)
    A = A.at[jnp.arange(n_out), lo].add(1.0 - frac)
    A = A.at[jnp.arange(n_out), lo + 1].add(frac)
    return A


def _bilinear_resize_align_corners(x_nchw, out_hw):
    # torch.nn.functional.interpolate(mode='bilinear', align_corners=True)
    Ho, Wo = out_hw
    _, _, H, W = x_nchw.shape
    Ah = _bilinear_matrix(Ho, H)
    Aw = _bilinear_matrix(Wo, W)
    return jnp.einsum('nchw,Hh,Ww->ncHW', x_nchw, Ah, Aw)


def _avg_pool2x2_crop(y_flat, g):
    # F.avg_pool2d((2,2)) then crop away the padded rows/cols.
    # TODO(synk): fuse the 2x2 average pool into the producing kernel's epilogue
    # (needs a sublane-strided store path); kept as cheap JAX glue for now.
    N = y_flat.shape[0]
    y = y_flat.reshape(N, g['R'], g['Wp'], g['Cout']).astype(jnp.float32)
    Hp2, Wp2 = g['Ho'] // 2, g['Wo'] // 2
    y = y[:, :2 * Hp2, :2 * Wp2, :]
    return y.reshape(N, Hp2, 2, Wp2, 2, g['Cout']).mean(axis=(2, 4))


def _crop(y_flat, g):
    N = y_flat.shape[0]
    y = y_flat.reshape(N, g['R'], g['Wp'], g['Cout'])
    return y[:, :g['Ho'], :g['Wo'], :].astype(jnp.float32)


# ----------------------------------------------------------------------------
# Discriminator / MultiScaleDiscriminator forward
# ----------------------------------------------------------------------------

def init_discriminator_params(key, *, num_channels, block_expansion, num_blocks,
                              max_features, num_kp, use_kp):
    params = {'blocks': []}
    for i in range(num_blocks):
        cin = (num_channels + num_kp * int(use_kp)) if i == 0 else \
            min(max_features, block_expansion * 2 ** i)
        cout = min(max_features, block_expansion * 2 ** (i + 1))
        key, kw, kb, kg, kbt = jax.random.split(key, 5)
        fan_in = cin * 16
        blk = {
            # stored as (kh, kw, Cin, Cout) == transpose of torch (Cout, Cin, kh, kw)
            'w': jax.random.normal(kw, (4, 4, cin, cout), jnp.float32) / jnp.sqrt(fan_in),
            'b': 0.01 * jax.random.normal(kb, (cout,), jnp.float32),
            'norm': i != 0,
            'pool': i != num_blocks - 1,
        }
        if blk['norm']:
            blk['gamma'] = 1.0 + 0.1 * jax.random.normal(kg, (cout,), jnp.float32)
            blk['beta'] = 0.1 * jax.random.normal(kbt, (cout,), jnp.float32)
        params['blocks'].append(blk)
    last_cout = min(max_features, block_expansion * 2 ** num_blocks)
    key, kw, kb = jax.random.split(key, 3)
    params['final_w'] = jax.random.normal(kw, (last_cout, 1), jnp.float32) / jnp.sqrt(last_cout)
    params['final_b'] = 0.01 * jax.random.normal(kb, (1,), jnp.float32)
    return params


def discriminator_forward(params, x_nchw, kp, *, kp_variance, use_kp):
    # 1) bilinear upsample to (256, 256), align_corners=True
    x = _bilinear_resize_align_corners(x_nchw.astype(jnp.float32), (256, 256))
    out = jnp.transpose(x, (0, 2, 3, 1))                      # NCHW -> NHWC

    # 2) keypoint gaussian heatmaps, concatenated on the channel axis
    if use_kp:
        heat = kp2gaussian_pallas(kp, (256, 256), kp_variance)  # (N, K, H, W)
        out = jnp.concatenate([out, jnp.transpose(heat, (0, 2, 3, 1))], axis=-1)

    feature_maps = []
    for blk in params['blocks']:
        cin, cout = blk['w'].shape[2], blk['w'].shape[3]
        w_taps = blk['w'].reshape(4, 4 * cin, cout)            # [dy, dx*Cin+ci, co]
        # conv (valid, stride 1) + bias; LeakyReLU fused when there is no norm
        y, g = conv4x4_bias_act(out, w_taps, blk['b'], apply_act=not blk['norm'])
        if blk['norm']:
            y = instance_norm_lrelu(
                y, blk['gamma'], blk['beta'], count=g['Ho'] * g['Wo'],
                out_dtype=jnp.bfloat16 if blk['pool'] else jnp.float32)
        fmap = _avg_pool2x2_crop(y, g) if blk['pool'] else _crop(y, g)
        feature_maps.append(jnp.transpose(fmap, (0, 3, 1, 2)))  # back to NCHW
        out = fmap

    # final 1x1 conv -> prediction map
    N, H, W, C = out.shape
    pred = pointwise_conv(out.reshape(N * H * W, C),
                          params['final_w'], params['final_b'])
    prediction_map = jnp.transpose(pred.reshape(N, H, W, 1), (0, 3, 1, 2))
    return feature_maps, prediction_map


def multi_scale_discriminator_forward(params_by_scale, x_dict, kp, *,
                                      kp_variance, use_kp):
    out_dict = {}
    for scale, params in params_by_scale.items():
        key = 'prediction_' + scale
        x = x_dict[key]
        fmaps, pred = discriminator_forward(params, x, kp,
                                            kp_variance=kp_variance, use_kp=use_kp)
        out_dict['feature_maps_' + scale] = fmaps
        out_dict['prediction_map_' + scale] = pred
    return out_dict


# ----------------------------------------------------------------------------
# Demo
# ----------------------------------------------------------------------------

if __name__ == "__main__":
    # small, deterministic configuration (module defaults shrunk for the demo)
    CFG = dict(num_channels=3, block_expansion=8, num_blocks=4,
               max_features=32, num_kp=4, use_kp=True)
    KP_VARIANCE = 0.01
    SCALES = (1,)

    key = jax.random.PRNGKey(0)
    k_x, k_kp, k_params = jax.random.split(key, 3)

    N, C, H, W = 2, CFG['num_channels'], 16, 16
    x = jax.random.normal(k_x, (N, C, H, W), jnp.float32)
    kp = jax.random.uniform(k_kp, (N, CFG['num_kp'], 2), jnp.float32,
                            minval=-1.0, maxval=1.0)

    params_by_scale = {}
    for scale in SCALES:
        k_params, sub = jax.random.split(k_params)
        params_by_scale[str(scale)] = init_discriminator_params(sub, **CFG)

    x_dict = {'prediction_' + str(s): x for s in SCALES}

    out = multi_scale_discriminator_forward(
        params_by_scale, x_dict, kp, kp_variance=KP_VARIANCE, use_kp=CFG['use_kp'])
    out = jax.block_until_ready(out)

    # light sanity checks on shapes
    fm = out['feature_maps_1']
    assert [tuple(f.shape) for f in fm] == [(2, 16, 126, 126), (2, 32, 61, 61),
                                            (2, 32, 29, 29), (2, 32, 26, 26)]
    assert tuple(out['prediction_map_1'].shape) == (2, 1, 26, 26)
    print("KERNEL_OK")
</pallas_src>

<mosaic_0001>
module attributes {stable_mosaic.version = 11 : i64} {
  func.func @_heatmap_kernel(%arg0: i32, %arg1: i32, %arg2: memref<1x1x1x256xf32, #tpu.memory_space<vmem>>, %arg3: memref<1x1x256x1xf32, #tpu.memory_space<vmem>>, %arg4: memref<1x1x256x256xf32, #tpu.memory_space<vmem>>) attributes {dimension_semantics = [#tpu.dimension_semantics<parallel>, #tpu.dimension_semantics<parallel>], iteration_bounds = array<i64: 2, 4>, scalar_prefetch = 0 : i64, scratch_operands = 0 : i64, tpu.core_type = #tpu.core_type<tc>, window_params = [{transform_indices = @transform_0, window_bounds = array<i64: 1, 1, 1, 256>}, {transform_indices = @transform_1, window_bounds = array<i64: 1, 1, 256, 1>}, {transform_indices = @transform_2, window_bounds = array<i64: 1, 1, 256, 256>}]} {
    %c0 = arith.constant 0 : index
    %c0_0 = arith.constant 0 : index
    %c0_1 = arith.constant 0 : index
    %c0_2 = arith.constant 0 : index
    %0 = vector.load %arg2[%c0, %c0_0, %c0_1, %c0_2] : memref<1x1x1x256xf32, #tpu.memory_space<vmem>>, vector<1x1x1x256xf32>
    %1 = vector.shape_cast %0 : vector<1x1x1x256xf32> to vector<1x256xf32>
    %c0_3 = arith.constant 0 : index
    %c0_4 = arith.constant 0 : index
    %c0_5 = arith.constant 0 : index
    %c0_6 = arith.constant 0 : index
    %2 = vector.load %arg3[%c0_3, %c0_4, %c0_5, %c0_6] : memref<1x1x256x1xf32, #tpu.memory_space<vmem>>, vector<1x1x256x1xf32>
    %3 = vector.shape_cast %2 : vector<1x1x256x1xf32> to vector<256x1xf32>
    %4 = vector.broadcast %1 : vector<1x256xf32> to vector<256x256xf32>
    %5 = vector.broadcast %3 : vector<256x1xf32> to vector<256x256xf32>
    %6 = arith.addf %4, %5 : vector<256x256xf32>
    %cst = arith.constant -5.000000e-01 : f32
    %7 = vector.broadcast %cst : f32 to vector<256x256xf32>
    %8 = arith.mulf %7, %6 : vector<256x256xf32>
    %cst_7 = arith.constant 0.00999999977 : f32
    %9 = vector.broadcast %cst_7 : f32 to vector<256x256xf32>
    %10 = arith.divf %8, %9 : vector<256x256xf32>
    %11 = math.exp %10 : vector<256x256xf32>
    %c0_8 = arith.constant 0 : index
    %c0_9 = arith.constant 0 : index
    %c0_10 = arith.constant 0 : index
    %c0_11 = arith.constant 0 : index
    %12 = vector.load %arg4[%c0_8, %c0_9, %c0_10, %c0_11] : memref<1x1x256x256xf32, #tpu.memory_space<vmem>>, vector<1x1x256x256xf32>
    %13 = vector.shape_cast %12 : vector<1x1x256x256xf32> to vector<256x256xf32>
    %14 = vector.shape_cast %11 : vector<256x256xf32> to vector<1x1x256x256xf32>
    tpu.vector_store %arg4[%c0_8, %c0_9, %c0_10, %c0_11], %14 {strides = array<i32>} : memref<1x1x256x256xf32, #tpu.memory_space<vmem>>, vector<1x1x256x256xf32>,
    return
  }
  func.func @transform_0(%arg0: i32, %arg1: i32) -> (i32, i32, i32, i32) {
    %c0_i32 = arith.constant 0 : i32
    %c0_i32_0 = arith.constant 0 : i32
    %c0_i32_1 = arith.constant 0 : i32
    return %arg0, %arg1, %c0_i32, %c0_i32_0 : i32, i32, i32, i32
  }
  func.func @transform_1(%arg0: i32, %arg1: i32) -> (i32, i32, i32, i32) {
    %c0_i32 = arith.constant 0 : i32
    %c0_i32_0 = arith.constant 0 : i32
    %c0_i32_1 = arith.constant 0 : i32
    return %arg0, %arg1, %c0_i32, %c0_i32_0 : i32, i32, i32, i32
  }
  func.func @transform_2(%arg0: i32, %arg1: i32) -> (i32, i32, i32, i32) {
    %c0_i32 = arith.constant 0 : i32
    %c0_i32_0 = arith.constant 0 : i32
    %c0_i32_1 = arith.constant 0 : i32
    return %arg0, %arg1, %c0_i32, %c0_i32_0 : i32, i32, i32, i32
  }
}

</mosaic_0001>

<bundles_post_ra>
// kernel: tpu_custom_call.1
= control target key start
LH: loop header
LB: loop body
LE: loop exit
PB: predicated region body
PF: predicated region fallthrough
CT: control target
= control target key end

     0   :  { %7 = vsyncpa [#allocation3], 0  ;;  %s1689_s0 = inlined_call_operand.hbm [shape: f32[2,4,1,256], index: 0, kind: input, shape index: {}]   ;;  %s1690_s1 = inlined_call_operand.vmem [shape: f32[2,4,256,1], index: 1, kind: input, shape index: {}]   ;;  %s1691_s2 = inlined_call_operand.hbm [shape: f32[2,4,256,256], index: 2, kind: output, shape index: {}]  }
   0x1   :  { %9 = vsyncpa [#allocation3 + $0x1], 0 }
   0x2   :  { %10 = vsyncpa [#allocation4], 0 }
   0x3   :  { %12 = vsyncpa [#allocation4 + $0x1], 0  ;;  %s1309_s9 = smov 0   ;;  %s1311_s10 = smov 0  }
   0x4   :  { %s1313_s11 = smov 0   ;;  %s1315_s12 = smov 0  }
   0x5   :  { %s1317_s13 = smov 0   ;;  %s1319_s14 = smov 0  }
   0x6   :  { %s1321_s15 = smov 0   ;;  %s1323_s16 = smov 0  }
   0x7 LB: > { %s928_s17 = sadd.s32 4294967295, %s1287_s16   ;;  %s929_s18 = sadd.s32 4294967294, %s1287_s16   ;;  %s1287_s16 = sphi %s1323_s16, %s18_s16   ;;  %s1283_s15 = sphi %s1321_s15, %s1708_s15   ;;  %s1279_s14 = sphi %s1319_s14, %s1707_s14   ;;  %s1275_s13 = sphi %s1317_s13, %s1706_s13   ;;  %s1271_s12 = sphi %s1315_s12, %s1705_s12   ;;  %s1267_s11 = sphi %s1313_s11, %s1704_s11   ;;  %s1263_s10 = sphi %s1311_s10, %s1703_s10   ;;  %s1259_s9 = sphi %s1309_s9, %s1702_s9  }
   0x8   : > { %s27_s19 = sadd.s32 1, %s1279_s14  ;;  %s30_s20 = sadd.s32 1, %s1283_s15 }
   0x9   : > { %p28_p0 = scmp.ge.s32.totalorder %s27_s19, 4  ;;  %s39_s21 = sadd.s32 1, %s1267_s11 }
   0xa   : > { %p46_p1 = scmp.ne.s32.totalorder %s1267_s11, %s1263_s10  ;;  %p47_p2 = scmp.eq.s32.totalorder %s1287_s16, 0 }
   0xb   : > { %s1710_s19 = smov (%p28_p0, %s27_s19), 0  ;;  %s1712_s20 = smov (!%p28_p0, %s30_s20), %s1283_s15 }
   0xc   : > { %s35_s22 = ssub.s32 %s1279_s14, %s1710_s19  ;;  %p1362_p3 = por %p47_p2, %p46_p1 }
   0xd   : > { %p32_p4 = scmp.ge.s32.totalorder %s1712_s20, 2  ;;  %p52_p5 = scmp.ne.s32.totalorder %s1263_s10, %s1259_s9 }
   0xe   : > { %p53_p6 = scmp.eq.s32.totalorder %s928_s17, 0  ;;  %p106_p7 = scmp.eq.s32.totalorder %s928_s17, 7 }
   0xf   : > { %s1714_s20 = smov (%p32_p4, %s1712_s20), 0  ;;  %p112_p10 = scmp.eq.s32.totalorder %s929_s18, 7 }
  0x10   : > { %p1370_p8 = por %p53_p6, %p52_p5  ;;  %p1374_p9 = por %p106_p7, %p46_p1 }
  0x11   : > { %s34_s26 = ssub.s32 %s1283_s15, %s1714_s20  ;;  %p1380_p12 = por %p112_p10, %p52_p5 }
  0x12   : > { %s1695_s25 = scalar_select %p1374_p9, 1, 0 }
  0x13   : > { %s36_s27 = sor.u32 %s35_s22, %s34_s26  ;;  %p960_p13 = scmp.lt.s32.totalorder %s1287_s16, 8 }
  0x14   : > { %p37_p11 = scmp.eq.s32.totalorder %s36_s27, 0  ;;  %s132_s29 = sand.u32 1, %s1267_s11  }
  0x15   : > { %s1696_s28 = scalar_select %p1380_p12, 1, 0 }
  0x16   : > { %s1387_s30 = scalar_select %p37_p11, %s1267_s11, %s39_s21  }
  0x17   : > { %s932_s3 = sshll.u32 %s132_s29, 1  ;;  %s933_s4 = sshll.u32 %s1279_s14, 1 }
  0x18   : > { %s934_s5 = sshll.u32 %s1283_s15, 3  ;;  %s136_s6 = scalar_lea.vmem [#allocation2], %s932_s3 }
  0x19   : > { %s146_s7 = sshll.u32 %s136_s6, 4  ;;  %s142_s8 = sadd.s32 %s934_s5, %s933_s4  ;;  %s1391_s7 = int_to_ptr.vmem [resolvable:$true] %s146_s7 }
  0x1a   : > { %s935_s17 = sshll.u32 %s142_s8, 4  ;;  %p1395_p0 = pnand %p960_p13, %p1362_p3 }
  0x1b   : > { %s1402_s21 = scalar_lea.hbm %s1689_s0, %s935_s17  ;;  %s133_s27 = scalar_lea.sflag [#allocation3], %s132_s29 }
  0x1c   : > { %s1159_s3 = scalar_lea.hbm %s1402_s21, 32  ;;  %p1161_p3 = pneg %p1395_p0 }
  0x1d   : > { %p1160_p4 = scmp.ne.s32.totalorder %s1402_s21, %s1159_s3  ;;  %s1164_s5 = scalar_lea.hbm %s1689_s0, 256 }
  0x1e   : > { %p1165_p7 = scmp.lt.u32.totalorder %s1402_s21, %s1689_s0  ;;  %p1166_p10 = scmp.lt.u32.totalorder %s1164_s5, %s1159_s3 }
  0x1f   : > { %p1162_p5 = pnand %p1161_p3, %p1160_p4  ;;  %p1168_p13 = scmp.lt.u32.totalorder %s1159_s3, %s1402_s21 }
  0x20   : > { %p1167_p11 = por %p1166_p10, %p1165_p7 }
  0x21   : > { %p1163_p6 = pneg %p1162_p5 }
  0x22   : > { %p1169_p1 = por %p1168_p13, %p1167_p11 }
  0x24   : > { %p1170_p2 = pnand %p1169_p1, %p1163_p6 }
  0x26   : > { %1173 = shalt.err (!%p1170_p2)
}
  0x27   : > { %s1174_s29 = scalar_lea.vmem %s1391_s7, 32  ;;  %s1289_s17 = smov [#allocation2]  }
  0x28   : > { %p1175_p4 = scmp.ne.s32.totalorder %s1391_s7, %s1174_s29  ;;  %s1179_s22 = sshll.u32 %s1289_s17, 4  ;;  %s1180_s22 = int_to_ptr.vmem [resolvable:$false] %s1179_s22 }
  0x29   : > { %s1181_s26 = scalar_lea.vmem %s1180_s22, 64  ;;  %p1182_p9 = scmp.lt.s32.totalorder %s1391_s7, %s1180_s22 }
  0x2a   : > { %p1177_p5 = pnand %p1175_p4, %p1161_p3  ;;  %p1183_p7 = scmp.lt.s32.totalorder %s1181_s26, %s1174_s29 }
  0x2c   : > { %p1178_p12 = pneg %p1177_p5  ;;  %p1184_p10 = por %p1183_p7, %p1182_p9 }
  0x2e   : > { %p1185_p11 = pnand %p1184_p10, %p1178_p12 }
  0x30   : > { %1188 = shalt.err (!%p1185_p11)
}
  0x31   : > { %955 = dma.hbm_to_vmem [thread:$0]  (!%p1395_p0), %s1402_s21, 32, %s1391_s7, %s133_s27  }
  0x32   : > { %p1698_p1 = scmp.lt.s32.totalorder %s1287_s16, 9  ;;  %p1699_p2 = scmp.ge.s32.totalorder %s1287_s16, 1 }
  0x34   : > { %p164_p3 = pnand %p1699_p2, %p1698_p1 }
  0x35   : > { %s1436_s3 = sand.u32 (!%p164_p3), 1, %s1263_s10  }
  0x36   : > { %167 = sbr.rel (%p164_p3) target bundleno = 311 (0x137), region = 28  ;;  %s937_s23 = sshll.u32 (!%p164_p3), %s1436_s3, 1 }
  0x37   : > { %s170_s4 = scalar_lea.sflag (!%p164_p3), [#allocation3], %s1436_s3  ;;  %s1440_s5 = scalar_lea.vmem (!%p164_p3), [#allocation2], %s937_s23 }
  0x3d   : > { %1250 = dma.done.wait (%p1370_p8), %s170_s4, 32  }
  0x3e   : > { %1252 = vsyncadd (%p1370_p8), %s170_s4, 4294967264  ;;  %p203_p9 = scmp.lt.s32.totalorder %s1275_s13, 1  ;;  %p205_p12 = scmp.lt.s32.totalorder %s1271_s12, 3  ;;  %v1290_v0 = vmov 0   ;;  %v246_v33 = vlaneseq  ;;  %v212_v37 = vld [vmem:[%s1440_s5] sm:$0x3] }
  0x3f   : > { %1030 = vset.pattern.permute.xlu1 %v1290_v0  ;;  %1029 = vset.pattern.permute.xlu0 %v1290_v0  ;;  %s938_s22 = sshll.u32 %s1436_s3, 9  ;;  %s943_s23 = sshll.u32 %s1271_s12, 6 }
  0x40   : > { %s204_s7 = scalar_select %p203_p9, %s1275_s13, 1  ;;  %v247_v34 = vshrl.u32 %v246_v33, 7 }
  0x41   : > { %s206_s18 = scalar_select %p205_p12, %s1271_s12, 3 }
  0x42   : > { %s940_s21 = sshll.u32 %s204_s7, 7  ;;  %v248_v35 = vsub.s32 0, %v247_v34  ;;  %v252_v36 = vsub.s32 1, %v247_v34  ;;  %s1509_s26 = scalar_lea.vmem [#allocation5], %s938_s22 }
  0x43   : > { %s939_s27 = sshll.u32 %s206_s18, 5  ;;  %s944_s4 = sshll.u32 %s1275_s13, 8 }
  0x44   : > { %s209_s6 = sadd.s32 %s940_s21, %s939_s27  ;;  %v1488_v38 = vrot.slane %v212_v37, %v248_v35  ;;  %v1490_v39 = vrot.slane %v212_v37, %v252_v36  ;;  %s814_s5 = sadd.s32 %s944_s4, %s943_s23 }
  0x45   : > { %s941_s8 = sshll.u32 %s209_s6, 3  ;;  %s945_s12 = sshll.u32 %s814_s5, 7 }
  0x46   : > { %s1453_s24 = scalar_lea.vmem %s1690_s1, %s941_s8  ;;  %s817_s13 = sshll.u32 %s1509_s26, 4  ;;  %s1632_s13 = int_to_ptr.vmem [resolvable:$true] %s817_s13 }
  0x47   : > { %v215_v1 = vld [vmem:[%s1453_s24 + $0x10] sm:$0xff]  ;;  %v213_v2 = vld [vmem:[%s1453_s24] sm:$0xff]  ;;  %v216_v3 = vld [vmem:[%s1453_s24 + $0x18] sm:$0xff]  ;;  %s1630_s21 = scalar_lea.hbm %s1691_s2, %s945_s12  ;;  %s802_s27 = scalar_lea.sflag [#allocation4], %s1436_s3 }
  0x48   : > { %268 = vperm.xlu1 %1030, %v215_v1   ;;  %258 = vperm.xlu0 %1029, %v213_v2   ;;  %v214_v4 = vld [vmem:[%s1453_s24 + $0x8] sm:$0xff]  ;;  %v217_v6 = vld [vmem:[%s1453_s24 + $0x20] sm:$0xff]  ;;  %v220_v7 = vld [vmem:[%s1453_s24 + $0x38] sm:$0xff]  ;;  %s1189_s6 = scalar_lea.vmem %s1632_s13, 8192  ;;  %p1700_p0 = scmp.ne.s32.totalorder %s1695_s25, 0 }
  0x49   : > { %v218_v5 = vld [vmem:[%s1453_s24 + $0x28] sm:$0xff]  ;;  %v219_v8 = vld [vmem:[%s1453_s24 + $0x30] sm:$0xff]  ;;  %v221_v10 = vld [vmem:[%s1453_s24 + $0x40] sm:$0xff]  ;;  %p1190_p8 = scmp.ne.s32.totalorder %s1632_s13, %s1189_s6  ;;  %s1291_s8 = smov [#allocation5]  }
  0x4a   : > { %v222_v9 = vld [vmem:[%s1453_s24 + $0x48] sm:$0xff]  ;;  %v224_v11 = vld [vmem:[%s1453_s24 + $0x58] sm:$0xff]  ;;  %v223_v12 = vld [vmem:[%s1453_s24 + $0x50] sm:$0xff]  ;;  %s1193_s29 = sshll.u32 %s1291_s8, 4  ;;  %s1194_s29 = int_to_ptr.vmem [resolvable:$false] %s1193_s29 }
  0x4b   : > { %v226_v13 = vld [vmem:[%s1453_s24 + $0x68] sm:$0xff]  ;;  %v225_v14 = vld [vmem:[%s1453_s24 + $0x60] sm:$0xff]  ;;  %v228_v15 = vld [vmem:[%s1453_s24 + $0x78] sm:$0xff]  ;;  %p1191_p6 = pnand %p1190_p8, %p1700_p0  ;;  %s1195_s17 = scalar_lea.vmem %s1194_s29, 16384 }
  0x4c   : > { %273 = vperm.xlu1 %1030, %v216_v3   ;;  %263 = vperm.xlu0 %1029, %v214_v4   ;;  %v227_v16 = vld [vmem:[%s1453_s24 + $0x70] sm:$0xff]  ;;  %v230_v17 = vld [vmem:[%s1453_s24 + $0x88] sm:$0xff]  ;;  %v229_v18 = vld [vmem:[%s1453_s24 + $0x80] sm:$0xff]  ;;  %p1196_p4 = scmp.lt.s32.totalorder %s1632_s13, %s1194_s29  ;;  %p1197_p5 = scmp.lt.s32.totalorder %s1195_s17, %s1189_s6 }
  0x4d   : > { %v232_v19 = vld [vmem:[%s1453_s24 + $0x98] sm:$0xff]  ;;  %v231_v20 = vld [vmem:[%s1453_s24 + $0x90] sm:$0xff]  ;;  %v234_v21 = vld [vmem:[%s1453_s24 + $0xa8] sm:$0xff]  ;;  %p1192_p13 = pneg %p1191_p6 }
  0x4e   : > { %v233_v22 = vld [vmem:[%s1453_s24 + $0xa0] sm:$0xff]  ;;  %v236_v23 = vld [vmem:[%s1453_s24 + $0xb8] sm:$0xff]  ;;  %v235_v24 = vld [vmem:[%s1453_s24 + $0xb0] sm:$0xff]  ;;  %p1198_p7 = por %p1197_p5, %p1196_p4 }
  0x4f   : > { %v238_v25 = vld [vmem:[%s1453_s24 + $0xc8] sm:$0xff]  ;;  %v237_v26 = vld [vmem:[%s1453_s24 + $0xc0] sm:$0xff]  ;;  %v240_v27 = vld [vmem:[%s1453_s24 + $0xd8] sm:$0xff] }
  0x50   : > { %283 = vperm.xlu1 %1030, %v218_v5   ;;  %278 = vperm.xlu0 %1029, %v217_v6   ;;  %v239_v28 = vld [vmem:[%s1453_s24 + $0xd0] sm:$0xff]  ;;  %v242_v29 = vld [vmem:[%s1453_s24 + $0xe8] sm:$0xff]  ;;  %v241_v30 = vld [vmem:[%s1453_s24 + $0xe0] sm:$0xff]  ;;  %p1199_p10 = pnand %p1198_p7, %p1192_p13 }
  0x51   : > { %v244_v31 = vld [vmem:[%s1453_s24 + $0xf8] sm:$0xff]  ;;  %v243_v32 = vld [vmem:[%s1453_s24 + $0xf0] sm:$0xff] }
  0x54   : > { %293 = vperm.xlu1 %1030, %v220_v7   ;;  %288 = vperm.xlu0 %1029, %v219_v8  }
  0x58   : > { %303 = vperm.xlu1 %1030, %v222_v9   ;;  %298 = vperm.xlu0 %1029, %v221_v10  }
  0x5c   : > { %313 = vperm.xlu1 %1030, %v224_v11   ;;  %308 = vperm.xlu0 %1029, %v223_v12  }
  0x60   : > { %323 = vperm.xlu1 %1030, %v226_v13   ;;  %318 = vperm.xlu0 %1029, %v225_v14  }
  0x64   : > { %333 = vperm.xlu1 %1030, %v228_v15   ;;  %328 = vperm.xlu0 %1029, %v227_v16  }
  0x68   : > { %343 = vperm.xlu1 %1030, %v230_v17   ;;  %338 = vperm.xlu0 %1029, %v229_v18  }
  0x6c   : > { %353 = vperm.xlu1 %1030, %v232_v19   ;;  %348 = vperm.xlu0 %1029, %v231_v20  }
  0x70   : > { %363 = vperm.xlu1 %1030, %v234_v21   ;;  %358 = vperm.xlu0 %1029, %v233_v22  }
  0x74   : > { %373 = vperm.xlu1 %1030, %v236_v23   ;;  %368 = vperm.xlu0 %1029, %v235_v24  }
  0x78   : > { %383 = vperm.xlu1 %1030, %v238_v25   ;;  %378 = vperm.xlu0 %1029, %v237_v26  }
  0x7c   : > { %393 = vperm.xlu1 %1030, %v240_v27   ;;  %388 = vperm.xlu0 %1029, %v239_v28  }
  0x80   : > { %403 = vperm.xlu1 %1030, %v242_v29   ;;  %398 = vperm.xlu0 %1029, %v241_v30  }
  0x84   : > { %413 = vperm.xlu1 %1030, %v244_v31   ;;  %408 = vperm.xlu0 %1029, %v243_v32  }
  0xc7   : > { %v269_v40 = vpop.permute.xlu1 %268  ;;  %v259_v41 = vpop.permute.xlu0 %258 }
  0xc8   : > { %v420_v42 = vadd.f32 %v269_v40, %v1488_v38  ;;  %v421_v43 = vadd.f32 %v269_v40, %v1490_v39  ;;  %v416_v44 = vadd.f32 %v259_v41, %v1488_v38  ;;  %v417_v45 = vadd.f32 %v259_v41, %v1490_v39 }
  0xca   : > { %v484_v46 = vmul.f32 -0.5, %v420_v42  ;;  %v485_v47 = vmul.f32 -0.5, %v421_v43  ;;  %v480_v48 = vmul.f32 -0.5, %v416_v44  ;;  %v481_v49 = vmul.f32 -0.5, %v417_v45 }
  0xcb   : > { %v274_v50 = vpop.permute.xlu1 %273  ;;  %v264_v51 = vpop.permute.xlu0 %263 }
  0xcc   : > { %v549_v52 = vmul.f32 100.0, %v484_v46  ;;  %v550_v53 = vmul.f32 100.0, %v485_v47  ;;  %v545_v54 = vmul.f32 100.0, %v480_v48  ;;  %v546_v55 = vmul.f32 100.0, %v481_v49 }
  0xcd   : > { %v422_v56 = vadd.f32 %v274_v50, %v1488_v38  ;;  %v423_v57 = vadd.f32 %v274_v50, %v1490_v39  ;;  %v418_v58 = vadd.f32 %v264_v51, %v1488_v38  ;;  %v419_v59 = vadd.f32 %v264_v51, %v1490_v39 }
  0xce   : > { %v617_v60 = vmul.f32 1.442695, %v549_v52  ;;  %v619_v61 = vmul.f32 1.442695, %v550_v53  ;;  %v609_v62 = vmul.f32 1.442695, %v545_v54 }
  0xcf   : > { %v611_v63 = vmul.f32 1.442695, %v546_v55  ;;  %v486_v0 = vmul.f32 -0.5, %v422_v56  ;;  %v487_v1 = vmul.f32 -0.5, %v423_v57  ;;  %v482_v2 = vmul.f32 -0.5, %v418_v58  ;;  %v284_v3 = vpop.permute.xlu1 %283  ;;  %v279_v4 = vpop.permute.xlu0 %278 }
  0xd0   : > { %1031 = vpow2.f32 %v617_v60  ;;  %v483_v5 = vmul.f32 -0.5, %v419_v59  ;;  %v426_v6 = vadd.f32 %v284_v3, %v1488_v38  ;;  %v427_v7 = vadd.f32 %v284_v3, %v1490_v39 }
  0xd1   : > { %1033 = vpow2.f32 %v619_v61  ;;  %v551_v8 = vmul.f32 100.0, %v486_v0  ;;  %v552_v9 = vmul.f32 100.0, %v487_v1  ;;  %v547_v10 = vmul.f32 100.0, %v482_v2 }
  0xd2   : > { %1035 = vpow2.f32 %v609_v62  ;;  %v548_v11 = vmul.f32 100.0, %v483_v5  ;;  %v490_v12 = vmul.f32 -0.5, %v426_v6  ;;  %v491_v13 = vmul.f32 -0.5, %v427_v7 }
  0xd3   : > { %1037 = vpow2.f32 %v611_v63  ;;  %v621_v14 = vmul.f32 1.442695, %v551_v8  ;;  %v623_v15 = vmul.f32 1.442695, %v552_v9  ;;  %v613_v16 = vmul.f32 1.442695, %v547_v10  ;;  %v294_v17 = vpop.permute.xlu1 %293  ;;  %v289_v18 = vpop.permute.xlu0 %288 }
  0xd4   : > { %v615_v19 = vmul.f32 1.442695, %v548_v11  ;;  %v555_v20 = vmul.f32 100.0, %v490_v12  ;;  %v556_v21 = vmul.f32 100.0, %v491_v13  ;;  %v424_v22 = vadd.f32 %v279_v4, %v1488_v38 }
  0xd5   : > { %1039 = vpow2.f32 %v621_v14  ;;  %v425_v23 = vadd.f32 %v279_v4, %v1490_v39  ;;  %v430_v24 = vadd.f32 %v294_v17, %v1488_v38  ;;  %v431_v25 = vadd.f32 %v294_v17, %v1490_v39 }
  0xd6   : > { %1041 = vpow2.f32 %v623_v15  ;;  %v629_v26 = vmul.f32 1.442695, %v555_v20  ;;  %v631_v27 = vmul.f32 1.442695, %v556_v21  ;;  %v488_v28 = vmul.f32 -0.5, %v424_v22 }
  0xd7   : > { %1043 = vpow2.f32 %v613_v16  ;;  %v489_v29 = vmul.f32 -0.5, %v425_v23  ;;  %v494_v30 = vmul.f32 -0.5, %v430_v24  ;;  %v495_v31 = vmul.f32 -0.5, %v431_v25  ;;  %v304_v32 = vpop.permute.xlu1 %303  ;;  %v299_v33 = vpop.permute.xlu0 %298 }
  0xd8   : > { %1045 = vpow2.f32 %v615_v19  ;;  %v553_v34 = vmul.f32 100.0, %v488_v28  ;;  %v428_v35 = vadd.f32 %v289_v18, %v1488_v38  ;;  %v429_v36 = vadd.f32 %v289_v18, %v1490_v39 }
  0xd9   : > { %1047 = vpow2.f32 %v629_v26  ;;  %v554_v37 = vmul.f32 100.0, %v489_v29  ;;  %v559_v40 = vmul.f32 100.0, %v494_v30  ;;  %v560_v41 = vmul.f32 100.0, %v495_v31 }
  0xda   : > { %v1032_v42 = vpop.eup %1031  ;;  %1049 = vpow2.f32 %v631_v27  ;;  %v625_v43 = vmul.f32 1.442695, %v553_v34  ;;  %v492_v44 = vmul.f32 -0.5, %v428_v35  ;;  %v493_v45 = vmul.f32 -0.5, %v429_v36 }
  0xdb   : > { %v1034_v46 = vpop.eup %1033  ;;  %741 = vst [vmem:[%s1509_s26 + $0x20] sm:$0xff] %v1032_v42  ;;  %v627_v47 = vmul.f32 1.442695, %v554_v37  ;;  %v637_v48 = vmul.f32 1.442695, %v559_v40  ;;  %v434_v50 = vadd.f32 %v304_v32, %v1488_v38  ;;  %v314_v51 = vpop.permute.xlu1 %313  ;;  %v435_v56 = vadd.f32 %v304_v32, %v1490_v39 }
  0xdc   : > { %v639_v49 = vmul.f32 1.442695, %v560_v41  ;;  %v309_v52 = vpop.permute.xlu0 %308  ;;  %v1036_v53 = vpop.eup %1035  ;;  %742 = vst [vmem:[%s1509_s26 + $0x28] sm:$0xff] %v1034_v46  ;;  %1051 = vpow2.f32 %v625_v43  ;;  %v557_v54 = vmul.f32 100.0, %v492_v44  ;;  %v558_v55 = vmul.f32 100.0, %v493_v45 }
  0xdd   : > { %v1038_v57 = vpop.eup %1037  ;;  %737 = vst [vmem:[%s1509_s26] sm:$0xff] %v1036_v53  ;;  %1053 = vpow2.f32 %v627_v47  ;;  %v498_v58 = vmul.f32 -0.5, %v434_v50  ;;  %v432_v59 = vadd.f32 %v299_v33, %v1488_v38  ;;  %v433_v60 = vadd.f32 %v299_v33, %v1490_v39 }
  0xde   : > { %738 = vst [vmem:[%s1509_s26 + $0x8] sm:$0xff] %v1038_v57  ;;  %1055 = vpow2.f32 %v637_v48  ;;  %v633_v61 = vmul.f32 1.442695, %v557_v54  ;;  %v635_v62 = vmul.f32 1.442695, %v558_v55  ;;  %v499_v63 = vmul.f32 -0.5, %v435_v56 }
  0xdf   : > { %v1040_v0 = vpop.eup %1039  ;;  %1057 = vpow2.f32 %v639_v49  ;;  %v563_v1 = vmul.f32 100.0, %v498_v58  ;;  %v496_v2 = vmul.f32 -0.5, %v432_v59  ;;  %v497_v3 = vmul.f32 -0.5, %v433_v60  ;;  %v324_v4 = vpop.permute.xlu1 %323 }
  0xe0   : > { %v319_v5 = vpop.permute.xlu0 %318  ;;  %v1042_v6 = vpop.eup %1041  ;;  %743 = vst [vmem:[%s1509_s26 + $0x30] sm:$0xff] %v1040_v0  ;;  %1059 = vpow2.f32 %v633_v61  ;;  %v564_v7 = vmul.f32 100.0, %v499_v63  ;;  %v438_v8 = vadd.f32 %v314_v51, %v1488_v38  ;;  %v439_v9 = vadd.f32 %v314_v51, %v1490_v39 }
  0xe1   : > { %v1044_v10 = vpop.eup %1043  ;;  %744 = vst [vmem:[%s1509_s26 + $0x38] sm:$0xff] %v1042_v6  ;;  %1061 = vpow2.f32 %v635_v62  ;;  %v645_v11 = vmul.f32 1.442695, %v563_v1  ;;  %v561_v12 = vmul.f32 100.0, %v496_v2  ;;  %v562_v13 = vmul.f32 100.0, %v497_v3 }
  0xe2   : > { %v1046_v14 = vpop.eup %1045  ;;  %739 = vst [vmem:[%s1509_s26 + $0x10] sm:$0xff] %v1044_v10  ;;  %v647_v15 = vmul.f32 1.442695, %v564_v7  ;;  %v502_v16 = vmul.f32 -0.5, %v438_v8  ;;  %v503_v17 = vmul.f32 -0.5, %v439_v9  ;;  %v436_v18 = vadd.f32 %v309_v52, %v1488_v38 }
  0xe3   : > { %v1048_v19 = vpop.eup %1047  ;;  %740 = vst [vmem:[%s1509_s26 + $0x18] sm:$0xff] %v1046_v14  ;;  %1063 = vpow2.f32 %v645_v11  ;;  %v641_v20 = vmul.f32 1.442695, %v561_v12  ;;  %v643_v21 = vmul.f32 1.442695, %v562_v13  ;;  %v437_v22 = vadd.f32 %v309_v52, %v1490_v39  ;;  %v334_v23 = vpop.permute.xlu1 %333 }
  0xe4   : > { %v329_v24 = vpop.permute.xlu0 %328  ;;  %v1050_v25 = vpop.eup %1049  ;;  %747 = vst [vmem:[%s1509_s26 + $0x50] sm:$0xff] %v1048_v19  ;;  %1065 = vpow2.f32 %v647_v15  ;;  %v567_v26 = vmul.f32 100.0, %v502_v16  ;;  %v568_v27 = vmul.f32 100.0, %v503_v17  ;;  %v500_v28 = vmul.f32 -0.5, %v436_v18 }
  0xe5   : > { %748 = vst [vmem:[%s1509_s26 + $0x58] sm:$0xff] %v1050_v25  ;;  %1067 = vpow2.f32 %v641_v20  ;;  %v501_v29 = vmul.f32 -0.5, %v437_v22  ;;  %v442_v30 = vadd.f32 %v324_v4, %v1488_v38  ;;  %v443_v31 = vadd.f32 %v324_v4, %v1490_v39 }
  0xe6   : > { %v1052_v32 = vpop.eup %1051  ;;  %1069 = vpow2.f32 %v643_v21  ;;  %v653_v33 = vmul.f32 1.442695, %v567_v26  ;;  %v655_v34 = vmul.f32 1.442695, %v568_v27  ;;  %v565_v35 = vmul.f32 100.0, %v500_v28 }
  0xe7   : > { %v1054_v36 = vpop.eup %1053  ;;  %745 = vst [vmem:[%s1509_s26 + $0x40] sm:$0xff] %v1052_v32  ;;  %v566_v37 = vmul.f32 100.0, %v501_v29  ;;  %v506_v40 = vmul.f32 -0.5, %v442_v30  ;;  %v507_v41 = vmul.f32 -0.5, %v443_v31  ;;  %v440_v42 = vadd.f32 %v319_v5, %v1488_v38  ;;  %v344_v43 = vpop.permute.xlu1 %343 }
  0xe8   : > { %v1533_v44 = vpop.permute.xlu0 %338  ;;  %v1056_v45 = vpop.eup %1055  ;;  %746 = vst [vmem:[%s1509_s26 + $0x48] sm:$0xff] %v1054_v36  ;;  %1071 = vpow2.f32 %v653_v33  ;;  %v649_v46 = vmul.f32 1.442695, %v565_v35  ;;  %v441_v47 = vadd.f32 %v319_v5, %v1490_v39  ;;  %v446_v48 = vadd.f32 %v334_v23, %v1488_v38 }
  0xe9   : > { %v1058_v49 = vpop.eup %1057  ;;  %751 = vst [vmem:[%s1509_s26 + $0x70] sm:$0xff] %v1056_v45  ;;  %1073 = vpow2.f32 %v655_v34  ;;  %v651_v50 = vmul.f32 1.442695, %v566_v37  ;;  %v571_v51 = vmul.f32 100.0, %v506_v40  ;;  %v572_v52 = vmul.f32 100.0, %v507_v41 }
  0xea   : > { %v1060_v53 = vpop.eup %1059  ;;  %752 = vst [vmem:[%s1509_s26 + $0x78] sm:$0xff] %v1058_v49  ;;  %1075 = vpow2.f32 %v649_v46  ;;  %v504_v54 = vmul.f32 -0.5, %v440_v42  ;;  %v505_v55 = vmul.f32 -0.5, %v441_v47  ;;  %v447_v56 = vadd.f32 %v334_v23, %v1490_v39 }
  0xeb   : > { %v1062_v57 = vpop.eup %1061  ;;  %749 = vst [vmem:[%s1509_s26 + $0x60] sm:$0xff] %v1060_v53  ;;  %1077 = vpow2.f32 %v651_v50  ;;  %v661_v58 = vmul.f32 1.442695, %v571_v51  ;;  %v663_v59 = vmul.f32 1.442695, %v572_v52  ;;  %v510_v60 = vmul.f32 -0.5, %v446_v48  ;;  %v354_v61 = vpop.permute.xlu1 %353 }
  0xec   : > { %750 = vst [vmem:[%s1509_s26 + $0x68] sm:$0xff] %v1062_v57  ;;  %v569_v62 = vmul.f32 100.0, %v504_v54  ;;  %v570_v63 = vmul.f32 100.0, %v505_v55  ;;  %v511_v0 = vmul.f32 -0.5, %v447_v56  ;;  %v444_v1 = vadd.f32 %v329_v24, %v1488_v38  ;;  %v349_v6 = vpop.permute.xlu0 %348 }
  0xed   : > { %v1064_v2 = vpop.eup %1063  ;;  %1079 = vpow2.f32 %v661_v58  ;;  %v575_v3 = vmul.f32 100.0, %v510_v60  ;;  %v445_v4 = vadd.f32 %v329_v24, %v1490_v39  ;;  %v450_v5 = vadd.f32 %v344_v43, %v1488_v38 }
  0xee   : > { %v1066_v7 = vpop.eup %1065  ;;  %755 = vst [vmem:[%s1509_s26 + $0x90] sm:$0xff] %v1064_v2  ;;  %1081 = vpow2.f32 %v663_v59  ;;  %v657_v8 = vmul.f32 1.442695, %v569_v62  ;;  %v659_v9 = vmul.f32 1.442695, %v570_v63  ;;  %v576_v10 = vmul.f32 100.0, %v511_v0 }
  0xef   : > { %v1068_v11 = vpop.eup %1067  ;;  %756 = vst [vmem:[%s1509_s26 + $0x98] sm:$0xff] %v1066_v7  ;;  %v669_v12 = vmul.f32 1.442695, %v575_v3  ;;  %v508_v13 = vmul.f32 -0.5, %v444_v1  ;;  %v509_v14 = vmul.f32 -0.5, %v445_v4  ;;  %v451_v15 = vadd.f32 %v344_v43, %v1490_v39  ;;  %v364_v20 = vpop.permute.xlu1 %363 }
  0xf0   : > { %v1070_v16 = vpop.eup %1069  ;;  %753 = vst [vmem:[%s1509_s26 + $0x80] sm:$0xff] %v1068_v11  ;;  %1083 = vpow2.f32 %v657_v8  ;;  %v671_v17 = vmul.f32 1.442695, %v576_v10  ;;  %v514_v18 = vmul.f32 -0.5, %v450_v5  ;;  %v448_v19 = vadd.f32 %v1533_v44, %v1488_v38  ;;  %v359_v32 = vpop.permute.xlu0 %358 }
  0xf1   : > { %754 = vst [vmem:[%s1509_s26 + $0x88] sm:$0xff] %v1070_v16  ;;  %1085 = vpow2.f32 %v659_v9  ;;  %v573_v21 = vmul.f32 100.0, %v508_v13  ;;  %v574_v22 = vmul.f32 100.0, %v509_v14  ;;  %v515_v23 = vmul.f32 -0.5, %v451_v15 }
  0xf2   : > { %v1072_v24 = vpop.eup %1071  ;;  %1087 = vpow2.f32 %v669_v12  ;;  %v579_v25 = vmul.f32 100.0, %v514_v18  ;;  %v449_v26 = vadd.f32 %v1533_v44, %v1490_v39  ;;  %v512_v27 = vmul.f32 -0.5, %v448_v19 }
  0xf3   : > { %v1074_v28 = vpop.eup %1073  ;;  %759 = vst [vmem:[%s1509_s26 + $0xb0] sm:$0xff] %v1072_v24  ;;  %1089 = vpow2.f32 %v671_v17  ;;  %v665_v29 = vmul.f32 1.442695, %v573_v21  ;;  %v667_v30 = vmul.f32 1.442695, %v574_v22  ;;  %v580_v31 = vmul.f32 100.0, %v515_v23  ;;  %v374_v47 = vpop.permute.xlu1 %373 }
  0xf4   : > { %v1076_v33 = vpop.eup %1075  ;;  %760 = vst [vmem:[%s1509_s26 + $0xb8] sm:$0xff] %v1074_v28  ;;  %v677_v34 = vmul.f32 1.442695, %v579_v25  ;;  %v513_v35 = vmul.f32 -0.5, %v449_v26  ;;  %v577_v36 = vmul.f32 100.0, %v512_v27  ;;  %v454_v37 = vadd.f32 %v354_v61, %v1488_v38  ;;  %v369_v59 = vpop.permute.xlu0 %368 }
  0xf5   : > { %v1078_v40 = vpop.eup %1077  ;;  %757 = vst [vmem:[%s1509_s26 + $0xa0] sm:$0xff] %v1076_v33  ;;  %1091 = vpow2.f32 %v665_v29  ;;  %v679_v41 = vmul.f32 1.442695, %v580_v31  ;;  %v455_v42 = vadd.f32 %v354_v61, %v1490_v39  ;;  %v452_v43 = vadd.f32 %v349_v6, %v1488_v38 }
  0xf6   : > { %758 = vst [vmem:[%s1509_s26 + $0xa8] sm:$0xff] %v1078_v40  ;;  %1093 = vpow2.f32 %v667_v30  ;;  %v578_v44 = vmul.f32 100.0, %v513_v35  ;;  %v673_v45 = vmul.f32 1.442695, %v577_v36  ;;  %v518_v46 = vmul.f32 -0.5, %v454_v37 }
  0xf7   : > { %v1080_v48 = vpop.eup %1079  ;;  %1095 = vpow2.f32 %v677_v34  ;;  %v519_v49 = vmul.f32 -0.5, %v455_v42  ;;  %v453_v50 = vadd.f32 %v349_v6, %v1490_v39  ;;  %v516_v51 = vmul.f32 -0.5, %v452_v43  ;;  %v384_v9 = vpop.permute.xlu1 %383 }
  0xf8   : > { %v1082_v52 = vpop.eup %1081  ;;  %763 = vst [vmem:[%s1509_s26 + $0xd0] sm:$0xff] %v1080_v48  ;;  %1097 = vpow2.f32 %v679_v41  ;;  %v675_v53 = vmul.f32 1.442695, %v578_v44  ;;  %v583_v54 = vmul.f32 100.0, %v518_v46  ;;  %v458_v55 = vadd.f32 %v364_v20, %v1488_v38  ;;  %v379_v21 = vpop.permute.xlu0 %378 }
  0xf9   : > { %764 = vst [vmem:[%s1509_s26 + $0xd8] sm:$0xff] %v1082_v52  ;;  %1099 = vpow2.f32 %v673_v45  ;;  %v584_v56 = vmul.f32 100.0, %v519_v49  ;;  %v517_v57 = vmul.f32 -0.5, %v453_v50  ;;  %v581_v58 = vmul.f32 100.0, %v516_v51 }
  0xfa   : > { %v1084_v60 = vpop.eup %1083  ;;  %1101 = vpow2.f32 %v675_v53  ;;  %v685_v61 = vmul.f32 1.442695, %v583_v54  ;;  %v459_v62 = vadd.f32 %v364_v20, %v1490_v39  ;;  %v522_v63 = vmul.f32 -0.5, %v458_v55 }
  0xfb   : > { %v1086_v0 = vpop.eup %1085  ;;  %761 = vst [vmem:[%s1509_s26 + $0xc0] sm:$0xff] %v1084_v60  ;;  %v687_v1 = vmul.f32 1.442695, %v584_v56  ;;  %v582_v2 = vmul.f32 100.0, %v517_v57  ;;  %v681_v3 = vmul.f32 1.442695, %v581_v58  ;;  %v456_v4 = vadd.f32 %v359_v32, %v1488_v38  ;;  %v394_v35 = vpop.permute.xlu1 %393 }
  0xfc   : > { %v1088_v5 = vpop.eup %1087  ;;  %762 = vst [vmem:[%s1509_s26 + $0xc8] sm:$0xff] %v1086_v0  ;;  %1103 = vpow2.f32 %v685_v61  ;;  %v523_v6 = vmul.f32 -0.5, %v459_v62  ;;  %v587_v7 = vmul.f32 100.0, %v522_v63  ;;  %v457_v8 = vadd.f32 %v359_v32, %v1490_v39  ;;  %v389_v49 = vpop.permute.xlu0 %388 }
  0xfd   : > { %v1090_v10 = vpop.eup %1089  ;;  %767 = vst [vmem:[%s1509_s26 + $0xf0] sm:$0xff] %v1088_v5  ;;  %1105 = vpow2.f32 %v687_v1  ;;  %v683_v11 = vmul.f32 1.442695, %v582_v2  ;;  %v520_v12 = vmul.f32 -0.5, %v456_v4  ;;  %v462_v13 = vadd.f32 %v374_v47, %v1488_v38 }
  0xfe   : > { %768 = vst [vmem:[%s1509_s26 + $0xf8] sm:$0xff] %v1090_v10  ;;  %1107 = vpow2.f32 %v681_v3  ;;  %v588_v14 = vmul.f32 100.0, %v523_v6  ;;  %v693_v15 = vmul.f32 1.442695, %v587_v7  ;;  %v521_v16 = vmul.f32 -0.5, %v457_v8 }
  0xff   : > { %v1092_v17 = vpop.eup %1091  ;;  %1109 = vpow2.f32 %v683_v11  ;;  %v585_v18 = vmul.f32 100.0, %v520_v12  ;;  %v463_v19 = vadd.f32 %v374_v47, %v1490_v39  ;;  %v526_v20 = vmul.f32 -0.5, %v462_v13  ;;  %v404_v63 = vpop.permute.xlu1 %403 }
 0x100   : > { %v1094_v22 = vpop.eup %1093  ;;  %765 = vst [vmem:[%s1509_s26 + $0xe0] sm:$0xff] %v1092_v17  ;;  %1111 = vpow2.f32 %v693_v15  ;;  %v695_v23 = vmul.f32 1.442695, %v588_v14  ;;  %v586_v24 = vmul.f32 100.0, %v521_v16  ;;  %v460_v25 = vadd.f32 %v369_v59, %v1488_v38  ;;  %v399_v12 = vpop.permute.xlu0 %398 }
 0x101   : > { %v1096_v26 = vpop.eup %1095  ;;  %766 = vst [vmem:[%s1509_s26 + $0xe8] sm:$0xff] %v1094_v22  ;;  %v689_v27 = vmul.f32 1.442695, %v585_v18  ;;  %v527_v28 = vmul.f32 -0.5, %v463_v19  ;;  %v591_v29 = vmul.f32 100.0, %v526_v20  ;;  %v461_v30 = vadd.f32 %v369_v59, %v1490_v39 }
 0x102   : > { %v1098_v31 = vpop.eup %1097  ;;  %771 = vst [vmem:[%s1509_s26 + $0x110] sm:$0xff] %v1096_v26  ;;  %1113 = vpow2.f32 %v695_v23  ;;  %v691_v32 = vmul.f32 1.442695, %v586_v24  ;;  %v524_v33 = vmul.f32 -0.5, %v460_v25  ;;  %v466_v34 = vadd.f32 %v384_v9, %v1488_v38 }
 0x103   : > { %v1100_v36 = vpop.eup %1099  ;;  %772 = vst [vmem:[%s1509_s26 + $0x118] sm:$0xff] %v1098_v31  ;;  %1115 = vpow2.f32 %v689_v27  ;;  %v592_v37 = vmul.f32 100.0, %v527_v28  ;;  %v701_v40 = vmul.f32 1.442695, %v591_v29  ;;  %v525_v41 = vmul.f32 -0.5, %v461_v30  ;;  %v414_v25 = vpop.permute.xlu1 %413 }
 0x104   : > { %v1102_v42 = vpop.eup %1101  ;;  %769 = vst [vmem:[%s1509_s26 + $0x100] sm:$0xff] %v1100_v36  ;;  %1117 = vpow2.f32 %v691_v32  ;;  %v589_v43 = vmul.f32 100.0, %v524_v33  ;;  %v467_v44 = vadd.f32 %v384_v9, %v1490_v39  ;;  %v530_v45 = vmul.f32 -0.5, %v466_v34 }
 0x105   : > { %770 = vst [vmem:[%s1509_s26 + $0x108] sm:$0xff] %v1102_v42  ;;  %1119 = vpow2.f32 %v701_v40  ;;  %v703_v46 = vmul.f32 1.442695, %v592_v37  ;;  %v590_v47 = vmul.f32 100.0, %v525_v41  ;;  %v464_v48 = vadd.f32 %v379_v21, %v1488_v38  ;;  %v409_v40 = vpop.permute.xlu0 %408 }
 0x106   : > { %v1104_v50 = vpop.eup %1103  ;;  %v697_v51 = vmul.f32 1.442695, %v589_v43  ;;  %v531_v52 = vmul.f32 -0.5, %v467_v44  ;;  %v595_v53 = vmul.f32 100.0, %v530_v45  ;;  %v465_v54 = vadd.f32 %v379_v21, %v1490_v39 }
 0x107   : > { %v1106_v55 = vpop.eup %1105  ;;  %775 = vst [vmem:[%s1509_s26 + $0x130] sm:$0xff] %v1104_v50  ;;  %1121 = vpow2.f32 %v703_v46  ;;  %v699_v56 = vmul.f32 1.442695, %v590_v47  ;;  %v528_v57 = vmul.f32 -0.5, %v464_v48  ;;  %v470_v58 = vadd.f32 %v394_v35, %v1488_v38 }
 0x108   : > { %v1108_v59 = vpop.eup %1107  ;;  %776 = vst [vmem:[%s1509_s26 + $0x138] sm:$0xff] %v1106_v55  ;;  %1123 = vpow2.f32 %v697_v51  ;;  %v596_v60 = vmul.f32 100.0, %v531_v52  ;;  %v709_v61 = vmul.f32 1.442695, %v595_v53  ;;  %v529_v62 = vmul.f32 -0.5, %v465_v54 }
 0x109   : > { %v1110_v0 = vpop.eup %1109  ;;  %773 = vst [vmem:[%s1509_s26 + $0x120] sm:$0xff] %v1108_v59  ;;  %1125 = vpow2.f32 %v699_v56  ;;  %v593_v1 = vmul.f32 100.0, %v528_v57  ;;  %v471_v2 = vadd.f32 %v394_v35, %v1490_v39  ;;  %v534_v3 = vmul.f32 -0.5, %v470_v58 }
 0x10a   : > { %v1112_v4 = vpop.eup %1111  ;;  %774 = vst [vmem:[%s1509_s26 + $0x128] sm:$0xff] %v1110_v0  ;;  %1127 = vpow2.f32 %v709_v61  ;;  %v711_v5 = vmul.f32 1.442695, %v596_v60  ;;  %v594_v6 = vmul.f32 100.0, %v529_v62  ;;  %v468_v7 = vadd.f32 %v389_v49, %v1488_v38 }
 0x10b   : > { %779 = vst [vmem:[%s1509_s26 + $0x150] sm:$0xff] %v1112_v4  ;;  %v705_v8 = vmul.f32 1.442695, %v593_v1  ;;  %v535_v9 = vmul.f32 -0.5, %v471_v2  ;;  %v599_v10 = vmul.f32 100.0, %v534_v3  ;;  %v469_v11 = vadd.f32 %v389_v49, %v1490_v39 }
 0x10c   : > { %v1114_v13 = vpop.eup %1113  ;;  %1129 = vpow2.f32 %v711_v5  ;;  %v707_v14 = vmul.f32 1.442695, %v594_v6  ;;  %v532_v15 = vmul.f32 -0.5, %v468_v7  ;;  %v474_v16 = vadd.f32 %v404_v63, %v1488_v38 }
 0x10d   : > { %v1116_v17 = vpop.eup %1115  ;;  %780 = vst [vmem:[%s1509_s26 + $0x158] sm:$0xff] %v1114_v13  ;;  %1131 = vpow2.f32 %v705_v8  ;;  %v600_v18 = vmul.f32 100.0, %v535_v9  ;;  %v717_v19 = vmul.f32 1.442695, %v599_v10  ;;  %v533_v20 = vmul.f32 -0.5, %v469_v11 }
 0x10e   : > { %v1118_v21 = vpop.eup %1117  ;;  %777 = vst [vmem:[%s1509_s26 + $0x140] sm:$0xff] %v1116_v17  ;;  %1133 = vpow2.f32 %v707_v14  ;;  %v597_v22 = vmul.f32 100.0, %v532_v15  ;;  %v475_v23 = vadd.f32 %v404_v63, %v1490_v39  ;;  %v538_v24 = vmul.f32 -0.5, %v474_v16 }
 0x10f   : > { %v1120_v26 = vpop.eup %1119  ;;  %778 = vst [vmem:[%s1509_s26 + $0x148] sm:$0xff] %v1118_v21  ;;  %1135 = vpow2.f32 %v717_v19  ;;  %v719_v27 = vmul.f32 1.442695, %v600_v18  ;;  %v598_v28 = vmul.f32 100.0, %v533_v20  ;;  %v472_v29 = vadd.f32 %v399_v12, %v1488_v38 }
 0x110   : > { %783 = vst [vmem:[%s1509_s26 + $0x170] sm:$0xff] %v1120_v26  ;;  %v713_v30 = vmul.f32 1.442695, %v597_v22  ;;  %v539_v31 = vmul.f32 -0.5, %v475_v23  ;;  %v603_v32 = vmul.f32 100.0, %v538_v24  ;;  %v473_v33 = vadd.f32 %v399_v12, %v1490_v39 }
 0x111   : > { %v1122_v34 = vpop.eup %1121  ;;  %1137 = vpow2.f32 %v719_v27  ;;  %v715_v35 = vmul.f32 1.442695, %v598_v28  ;;  %v536_v36 = vmul.f32 -0.5, %v472_v29  ;;  %v478_v37 = vadd.f32 %v414_v25, %v1488_v38 }
 0x112   : > { %v1124_v41 = vpop.eup %1123  ;;  %784 = vst [vmem:[%s1509_s26 + $0x178] sm:$0xff] %v1122_v34  ;;  %1139 = vpow2.f32 %v713_v30  ;;  %v604_v42 = vmul.f32 100.0, %v539_v31  ;;  %v725_v43 = vmul.f32 1.442695, %v603_v32  ;;  %v537_v44 = vmul.f32 -0.5, %v473_v33 }
 0x113   : > { %v1126_v45 = vpop.eup %1125  ;;  %781 = vst [vmem:[%s1509_s26 + $0x160] sm:$0xff] %v1124_v41  ;;  %1141 = vpow2.f32 %v715_v35  ;;  %v601_v46 = vmul.f32 100.0, %v536_v36  ;;  %v479_v47 = vadd.f32 %v414_v25, %v1490_v39  ;;  %v542_v48 = vmul.f32 -0.5, %v478_v37 }
 0x114   : > { %v1128_v49 = vpop.eup %1127  ;;  %782 = vst [vmem:[%s1509_s26 + $0x168] sm:$0xff] %v1126_v45  ;;  %1143 = vpow2.f32 %v725_v43  ;;  %v727_v50 = vmul.f32 1.442695, %v604_v42  ;;  %v602_v51 = vmul.f32 100.0, %v537_v44  ;;  %v476_v52 = vadd.f32 %v409_v40, %v1488_v38 }
 0x115   : > { %787 = vst [vmem:[%s1509_s26 + $0x190] sm:$0xff] %v1128_v49  ;;  %v721_v53 = vmul.f32 1.442695, %v601_v46  ;;  %v543_v54 = vmul.f32 -0.5, %v479_v47  ;;  %v607_v55 = vmul.f32 100.0, %v542_v48  ;;  %v477_v56 = vadd.f32 %v409_v40, %v1490_v39 }
 0x116   : > { %v1130_v57 = vpop.eup %1129  ;;  %1145 = vpow2.f32 %v727_v50  ;;  %v723_v58 = vmul.f32 1.442695, %v602_v51  ;;  %v540_v59 = vmul.f32 -0.5, %v476_v52 }
 0x117   : > { %v1132_v60 = vpop.eup %1131  ;;  %788 = vst [vmem:[%s1509_s26 + $0x198] sm:$0xff] %v1130_v57  ;;  %1147 = vpow2.f32 %v721_v53  ;;  %v608_v61 = vmul.f32 100.0, %v543_v54  ;;  %v733_v62 = vmul.f32 1.442695, %v607_v55  ;;  %v541_v63 = vmul.f32 -0.5, %v477_v56 }
 0x118   : > { %v1134_v38 = vpop.eup %1133  ;;  %785 = vst [vmem:[%s1509_s26 + $0x180] sm:$0xff] %v1132_v60  ;;  %1149 = vpow2.f32 %v723_v58  ;;  %v605_v0 = vmul.f32 100.0, %v540_v59 }
 0x119   : > { %v1136_v39 = vpop.eup %1135  ;;  %786 = vst [vmem:[%s1509_s26 + $0x188] sm:$0xff] %v1134_v38  ;;  %1151 = vpow2.f32 %v733_v62  ;;  %v735_v1 = vmul.f32 1.442695, %v608_v61  ;;  %v606_v2 = vmul.f32 100.0, %v541_v63 }
 0x11a   : > { %791 = vst [vmem:[%s1509_s26 + $0x1b0] sm:$0xff] %v1136_v39  ;;  %v729_v3 = vmul.f32 1.442695, %v605_v0 }
 0x11b   : > { %v1138_v4 = vpop.eup %1137  ;;  %1153 = vpow2.f32 %v735_v1  ;;  %v731_v5 = vmul.f32 1.442695, %v606_v2 }
 0x11c   : > { %v1140_v6 = vpop.eup %1139  ;;  %792 = vst [vmem:[%s1509_s26 + $0x1b8] sm:$0xff] %v1138_v4  ;;  %1155 = vpow2.f32 %v729_v3 }
 0x11d   : > { %v1142_v7 = vpop.eup %1141  ;;  %789 = vst [vmem:[%s1509_s26 + $0x1a0] sm:$0xff] %v1140_v6  ;;  %1157 = vpow2.f32 %v731_v5 }
 0x11e   : > { %v1144_v8 = vpop.eup %1143  ;;  %790 = vst [vmem:[%s1509_s26 + $0x1a8] sm:$0xff] %v1142_v7 }
 0x11f   : > { %795 = vst [vmem:[%s1509_s26 + $0x1d0] sm:$0xff] %v1144_v8 }
 0x120   : > { %v1146_v9 = vpop.eup %1145 }
 0x121   : > { %v1148_v10 = vpop.eup %1147  ;;  %796 = vst [vmem:[%s1509_s26 + $0x1d8] sm:$0xff] %v1146_v9 }
 0x122   : > { %v1150_v11 = vpop.eup %1149  ;;  %793 = vst [vmem:[%s1509_s26 + $0x1c0] sm:$0xff] %v1148_v10 }
 0x123   : > { %v1152_v12 = vpop.eup %1151  ;;  %794 = vst [vmem:[%s1509_s26 + $0x1c8] sm:$0xff] %v1150_v11 }
 0x124   : > { %799 = vst [vmem:[%s1509_s26 + $0x1f0] sm:$0xff] %v1152_v12 }
 0x125   : > { %v1154_v13 = vpop.eup %1153 }
 0x126   : > { %v1156_v14 = vpop.eup %1155  ;;  %800 = vst [vmem:[%s1509_s26 + $0x1f8] sm:$0xff] %v1154_v13 }
 0x127   : > { %v1158_v15 = vpop.eup %1157  ;;  %797 = vst [vmem:[%s1509_s26 + $0x1e0] sm:$0xff] %v1156_v14 }
 0x128   : > { %798 = vst [vmem:[%s1509_s26 + $0x1e8] sm:$0xff] %v1158_v15 }
 0x129   : > { %1202 = shalt.err (!%p1199_p10)
}
 0x12a   : > { %s1203_s24 = scalar_lea.hbm %s1630_s21, 8192  ;;  %s1207_s23 = scalar_lea.hbm %s1691_s2, 65536 }
 0x12b   : > { %p1204_p11 = scmp.ne.s32.totalorder %s1630_s21, %s1203_s24  ;;  %p1208_p3 = scmp.lt.u32.totalorder %s1630_s21, %s1691_s2 }
 0x12c   : > { %p1209_p9 = scmp.lt.u32.totalorder %s1207_s23, %s1203_s24  ;;  %p1211_p8 = scmp.lt.u32.totalorder %s1203_s24, %s1630_s21 }
 0x12d   : > { %p1205_p1 = pnand %p1204_p11, %p1700_p0 }
 0x12e   : > { %p1210_p12 = por %p1209_p9, %p1208_p3 }
 0x12f   : > { %p1206_p2 = pneg %p1205_p1 }
 0x130   : > { %p1212_p6 = por %p1211_p8, %p1210_p12 }
 0x132   : > { %p1213_p13 = pnand %p1212_p6, %p1206_p2 }
 0x134   : > { %1216 = shalt.err (!%p1213_p13)
}
 0x135   : > { %s1292_s12 = smov 256   ;;  %s1293_s7 = smov 16  }
 0x136   : > { %950 = dma.vmem_to_hbm [thread:$0]  (%p1700_p0), %s1632_s13, 8192, %s1630_s21, %s802_s27, %s1292_s12, %s1292_s12, %s1293_s7  }
 0x137 PF: > { %p961_p4 = scmp.ge.s32.totalorder %s1287_s16, 2  ;;  %s832_s18 = sand.u32 1, %s1259_s9  }
 0x138   : > { %p1701_p5 = scmp.ne.s32.totalorder %s1696_s28, 0  ;;  %s833_s6 = scalar_lea.sflag [#allocation4], %s832_s18 }
 0x13a   : > { %p957_p7 = pnand %p961_p4, %p1701_p5 }
 0x13c   : > { %1254 = dma.done.wait (!%p957_p7), %s833_s6, 8192  }
 0x13d   : > { %1256 = vsyncadd (!%p957_p7), %s833_s6, 4294959104  ;;  %s18_s16 = sadd.s32 1, %s1287_s16   ;;  %s1702_s9 = smov %s1263_s10 }
 0x13e   : > { %p15_p10 = scmp.ge.s32.totalorder %s18_s16, 10   ;;  %s1703_s10 = smov %s1267_s11 }
 0x13f   : > { %s1704_s11 = smov %s1387_s30  ;;  %s1705_s12 = smov %s1279_s14 }
 0x140   : > { %s1706_s13 = smov %s1283_s15  ;;  %s1707_s14 = smov %s1710_s19 }
 0x141   : > { %s1708_s15 = smov %s1714_s20  ;;  %17 = sbr.rel (!%p15_p10) target bundleno = 7 (0x7), region = 76 }
 0x148   :  { %838 = vsyncpa [#allocation3], 1 }
 0x149   :  { %840 = vsyncpa [#allocation3 + $0x1], 1 }
 0x14a   :  { %841 = vsyncpa [#allocation4], 1 }
 0x14b   :  { %843 = vsyncpa [#allocation4 + $0x1], 1 }

</bundles_post_ra>
